<compile_context>
chip_gen: v7x
topology: tpu7x:2x2x1
jax: 0.10.0
libtpu: 0.0.40
codegen_flags: <defaults>
</compile_context>

<pallas_src>
import functools

import jax
import jax.numpy as jnp
from jax.experimental import pallas as pl
from jax.experimental.pallas import tpu as pltpu


def ventasnet_kernel(params_ref, x_ref, o_ref, *, input_size, hidden_size, output_size):
    """params_ref: SMEM flat [w1 (in*hid), b1 (hid), w2 (hid*out), b2 (out)].
    x_ref: (input_size, TILE_B) VMEM tile (batch on lanes).
    o_ref: (output_size, TILE_B) VMEM tile."""
    x = x_ref[...]  # (input_size, TILE_B) f32
    tile_b = x.shape[1]

    w1_off = 0
    b1_off = input_size * hidden_size
    w2_off = b1_off + hidden_size
    b2_off = w2_off + hidden_size * output_size

    # ---- layer1 + ReLU: fully unrolled VPU multiply-adds (no MXU) ----
    hidden = []
    for j in range(hidden_size):
        h = jnp.full((1, tile_b), params_ref[b1_off + j], dtype=jnp.float32)
        for i in range(input_size):
            h = h + params_ref[w1_off + i * hidden_size + j] * x[i:i + 1, :]
        hidden.append(jnp.maximum(h, 0.0))

    # ---- layer2: hidden_size-term multiply-accumulate per output ----
    outs = []
    for k in range(output_size):
        acc = jnp.full((1, tile_b), params_ref[b2_off + k], dtype=jnp.float32)
        for j in range(hidden_size):
            acc = acc + params_ref[w2_off + j * output_size + k] * hidden[j]
        outs.append(acc)

    o_ref[...] = outs[0] if output_size == 1 else jnp.concatenate(outs, axis=0)


def ventasnet_forward(x, w1, b1, w2, b2, *, tile_b=128):
    """x: (B, input_size) f32. w1: (in, hid), b1: (hid,), w2: (hid, out), b2: (out,).
    Returns (B, output_size) f32."""
    B, input_size = x.shape
    hidden_size = w1.shape[1]
    output_size = w2.shape[1]

    # Pack all parameters into one flat f32 array -> single SMEM transfer.
    params = jnp.concatenate(
        [w1.reshape(-1), b1.reshape(-1), w2.reshape(-1), b2.reshape(-1)]
    ).astype(jnp.float32)

    # Lane-dense layout: batch on the lane axis, padded to a multiple of tile_b.
    b_pad = pl.cdiv(B, tile_b) * tile_b
    x_t = jnp.zeros((input_size, b_pad), jnp.float32).at[:, :B].set(x.T)

    grid = (b_pad // tile_b,)
    kernel = functools.partial(
        ventasnet_kernel,
        input_size=input_size,
        hidden_size=hidden_size,
        output_size=output_size,
    )

    out_t = pl.pallas_call(
        kernel,
        out_shape=jax.ShapeDtypeStruct((output_size, b_pad), jnp.float32),
        grid=grid,
        in_specs=[
            pl.BlockSpec(memory_space=pltpu.MemorySpace.SMEM),       # packed params
            pl.BlockSpec((input_size, tile_b), lambda i: (0, i)),    # x tile (lane-dense)
        ],
        out_specs=pl.BlockSpec((output_size, tile_b), lambda i: (0, i)),
        compiler_params=pltpu.CompilerParams(
            dimension_semantics=("parallel",),
        ),
    )(params, x_t)

    # Crop padding and return the PyTorch-style (B, output_size) layout.
    return out_t[:, :B].T


def torch_like_linear_init(key, in_features, out_features):
    """Deterministic init mimicking nn.Linear's U(-1/sqrt(in), 1/sqrt(in)).
    Stored as (in, out) / (out,) so the reference computes x @ W + b."""
    kw, kb = jax.random.split(key)
    bound = 1.0 / jnp.sqrt(jnp.float32(in_features))
    w = jax.random.uniform(kw, (in_features, out_features), jnp.float32, -bound, bound)
    b = jax.random.uniform(kb, (out_features,), jnp.float32, -bound, bound)
    return w, b


if __name__ == "__main__":
    input_size, hidden_size, output_size = 1, 5, 1

    key = jax.random.PRNGKey(0)
    k_x, k_x2, k_l1, k_l2 = jax.random.split(key, 4)

    w1, b1 = torch_like_linear_init(k_l1, input_size, hidden_size)
    w2, b2 = torch_like_linear_init(k_l2, hidden_size, output_size)

    def reference(xx):
        return jnp.maximum(xx @ w1 + b1, 0.0) @ w2 + b2

    # Case 1: native tiny batch (single grid step, fully padded tile).
    x_small = jax.random.normal(k_x, (8, input_size), jnp.float32)
    out_small = jax.block_until_ready(ventasnet_forward(x_small, w1, b1, w2, b2))
    assert out_small.shape == (8, output_size)
    assert jnp.allclose(out_small, reference(x_small), atol=1e-5, rtol=1e-5)

    # Case 2: larger batch exercising multiple grid steps + a partial final tile.
    x_big = jax.random.normal(k_x2, (300, input_size), jnp.float32)
    out_big = jax.block_until_ready(ventasnet_forward(x_big, w1, b1, w2, b2))
    assert out_big.shape == (300, output_size)
    assert jnp.allclose(out_big, reference(x_big), atol=1e-5, rtol=1e-5)

    print("KERNEL_OK")
</pallas_src>

<mosaic_0001>
module attributes {stable_mosaic.version = 11 : i64} {
  func.func @ventasnet_kernel(%arg0: i32, %arg1: memref<16xf32, #tpu.memory_space<smem>>, %arg2: memref<1x128xf32, #tpu.memory_space<vmem>>, %arg3: memref<1x128xf32, #tpu.memory_space<vmem>>) attributes {dimension_semantics = [#tpu.dimension_semantics<parallel>], iteration_bounds = array<i64: 1>, scalar_prefetch = 0 : i64, scratch_operands = 0 : i64, tpu.core_type = #tpu.core_type<tc>, window_params = [{transform_indices = @transform_0, window_bounds = array<i64: 16>}, {transform_indices = @transform_1, window_bounds = array<i64: 1, 128>}, {transform_indices = @transform_2, window_bounds = array<i64: 1, 128>}]} {
    %c0 = arith.constant 0 : index
    %c0_0 = arith.constant 0 : index
    %0 = vector.load %arg2[%c0, %c0_0] : memref<1x128xf32, #tpu.memory_space<vmem>>, vector<1x128xf32>
    %c5 = arith.constant 5 : index
    %1 = memref.load %arg1[%c5] : memref<16xf32, #tpu.memory_space<smem>>
    %2 = vector.broadcast %1 : f32 to vector<1x128xf32>
    %c0_1 = arith.constant 0 : index
    %3 = memref.load %arg1[%c0_1] : memref<16xf32, #tpu.memory_space<smem>>
    %4 = vector.broadcast %3 : f32 to vector<1x128xf32>
    %5 = arith.mulf %4, %0 : vector<1x128xf32>
    %6 = arith.addf %2, %5 : vector<1x128xf32>
    %cst = arith.constant 0.000000e+00 : f32
    %7 = vector.broadcast %cst : f32 to vector<1x128xf32>
    %8 = arith.maximumf %6, %7 : vector<1x128xf32>
    %c6 = arith.constant 6 : index
    %9 = memref.load %arg1[%c6] : memref<16xf32, #tpu.memory_space<smem>>
    %10 = vector.broadcast %9 : f32 to vector<1x128xf32>
    %c1 = arith.constant 1 : index
    %11 = memref.load %arg1[%c1] : memref<16xf32, #tpu.memory_space<smem>>
    %12 = vector.broadcast %11 : f32 to vector<1x128xf32>
    %13 = arith.mulf %12, %0 : vector<1x128xf32>
    %14 = arith.addf %10, %13 : vector<1x128xf32>
    %cst_2 = arith.constant 0.000000e+00 : f32
    %15 = vector.broadcast %cst_2 : f32 to vector<1x128xf32>
    %16 = arith.maximumf %14, %15 : vector<1x128xf32>
    %c7 = arith.constant 7 : index
    %17 = memref.load %arg1[%c7] : memref<16xf32, #tpu.memory_space<smem>>
    %18 = vector.broadcast %17 : f32 to vector<1x128xf32>
    %c2 = arith.constant 2 : index
    %19 = memref.load %arg1[%c2] : memref<16xf32, #tpu.memory_space<smem>>
    %20 = vector.broadcast %19 : f32 to vector<1x128xf32>
    %21 = arith.mulf %20, %0 : vector<1x128xf32>
    %22 = arith.addf %18, %21 : vector<1x128xf32>
    %cst_3 = arith.constant 0.000000e+00 : f32
    %23 = vector.broadcast %cst_3 : f32 to vector<1x128xf32>
    %24 = arith.maximumf %22, %23 : vector<1x128xf32>
    %c8 = arith.constant 8 : index
    %25 = memref.load %arg1[%c8] : memref<16xf32, #tpu.memory_space<smem>>
    %26 = vector.broadcast %25 : f32 to vector<1x128xf32>
    %c3 = arith.constant 3 : index
    %27 = memref.load %arg1[%c3] : memref<16xf32, #tpu.memory_space<smem>>
    %28 = vector.broadcast %27 : f32 to vector<1x128xf32>
    %29 = arith.mulf %28, %0 : vector<1x128xf32>
    %30 = arith.addf %26, %29 : vector<1x128xf32>
    %cst_4 = arith.constant 0.000000e+00 : f32
    %31 = vector.broadcast %cst_4 : f32 to vector<1x128xf32>
    %32 = arith.maximumf %30, %31 : vector<1x128xf32>
    %c9 = arith.constant 9 : index
    %33 = memref.load %arg1[%c9] : memref<16xf32, #tpu.memory_space<smem>>
    %34 = vector.broadcast %33 : f32 to vector<1x128xf32>
    %c4 = arith.constant 4 : index
    %35 = memref.load %arg1[%c4] : memref<16xf32, #tpu.memory_space<smem>>
    %36 = vector.broadcast %35 : f32 to vector<1x128xf32>
    %37 = arith.mulf %36, %0 : vector<1x128xf32>
    %38 = arith.addf %34, %37 : vector<1x128xf32>
    %cst_5 = arith.constant 0.000000e+00 : f32
    %39 = vector.broadcast %cst_5 : f32 to vector<1x128xf32>
    %40 = arith.maximumf %38, %39 : vector<1x128xf32>
    %c15 = arith.constant 15 : index
    %41 = memref.load %arg1[%c15] : memref<16xf32, #tpu.memory_space<smem>>
    %42 = vector.broadcast %41 : f32 to vector<1x128xf32>
    %c10 = arith.constant 10 : index
    %43 = memref.load %arg1[%c10] : memref<16xf32, #tpu.memory_space<smem>>
    %44 = vector.broadcast %43 : f32 to vector<1x128xf32>
    %45 = arith.mulf %44, %8 : vector<1x128xf32>
    %46 = arith.addf %42, %45 : vector<1x128xf32>
    %c11 = arith.constant 11 : index
    %47 = memref.load %arg1[%c11] : memref<16xf32, #tpu.memory_space<smem>>
    %48 = vector.broadcast %47 : f32 to vector<1x128xf32>
    %49 = arith.mulf %48, %16 : vector<1x128xf32>
    %50 = arith.addf %46, %49 : vector<1x128xf32>
    %c12 = arith.constant 12 : index
    %51 = memref.load %arg1[%c12] : memref<16xf32, #tpu.memory_space<smem>>
    %52 = vector.broadcast %51 : f32 to vector<1x128xf32>
    %53 = arith.mulf %52, %24 : vector<1x128xf32>
    %54 = arith.addf %50, %53 : vector<1x128xf32>
    %c13 = arith.constant 13 : index
    %55 = memref.load %arg1[%c13] : memref<16xf32, #tpu.memory_space<smem>>
    %56 = vector.broadcast %55 : f32 to vector<1x128xf32>
    %57 = arith.mulf %56, %32 : vector<1x128xf32>
    %58 = arith.addf %54, %57 : vector<1x128xf32>
    %c14 = arith.constant 14 : index
    %59 = memref.load %arg1[%c14] : memref<16xf32, #tpu.memory_space<smem>>
    %60 = vector.broadcast %59 : f32 to vector<1x128xf32>
    %61 = arith.mulf %60, %40 : vector<1x128xf32>
    %62 = arith.addf %58, %61 : vector<1x128xf32>
    %c0_6 = arith.constant 0 : index
    %c0_7 = arith.constant 0 : index
    %63 = vector.load %arg3[%c0_6, %c0_7] : memref<1x128xf32, #tpu.memory_space<vmem>>, vector<1x128xf32>
    tpu.vector_store %arg3[%c0_6, %c0_7], %62 {strides = array<i32>} : memref<1x128xf32, #tpu.memory_space<vmem>>, vector<1x128xf32>,
    return
  }
  func.func @transform_0(%arg0: i32) -> i32 {
    %c0_i32 = arith.constant 0 : i32
    %c0_i32_0 = arith.constant 0 : i32
    return %c0_i32 : i32
  }
  func.func @transform_1(%arg0: i32) -> (i32, i32) {
    %c0_i32 = arith.constant 0 : i32
    %c0_i32_0 = arith.constant 0 : i32
    return %c0_i32, %arg0 : i32, i32
  }
  func.func @transform_2(%arg0: i32) -> (i32, i32) {
    %c0_i32 = arith.constant 0 : i32
    %c0_i32_0 = arith.constant 0 : i32
    return %c0_i32, %arg0 : i32, i32
  }
}

</mosaic_0001>

<bundles_post_ra>
// kernel: tpu_custom_call.1
= control target key start
LH: loop header
LB: loop body
LE: loop exit
PB: predicated region body
PF: predicated region fallthrough
CT: control target
= control target key end

     0   :  { %7 = vsyncpa [#allocation4], 0  ;;  %s218_s0 = inlined_call_operand.hbm [shape: f32[16], index: 0, kind: input, shape index: {}]   ;;  %s219_s1 = inlined_call_operand.vmem [shape: f32[1,128], index: 1, kind: input, shape index: {}]   ;;  %s220_s2 = inlined_call_operand.hbm [shape: f32[1,128], index: 2, kind: output, shape index: {}]  }
   0x1   :  { %8 = vsyncpa [#allocation3], 0  ;;  %s114_s11 = scalar_lea.hbm %s218_s0, 16 }
   0x2   :  { %p115_p0 = scmp.ne.s32.totalorder %s218_s0, %s114_s11  ;;  %p118_p1 = scmp.lt.u32.totalorder %s114_s11, %s218_s0 }
   0x4   :  { %p120_p2 = pnand %p118_p1, %p115_p0 }
   0x6   :  { %123 = shalt.err (!%p120_p2)
}
   0x7   :  { %s150_s16 = smov [#allocation2]  }
   0x8   :  { %16 = dma.hbm_to_smem %s218_s0, 16, %s150_s16, [#allocation4]  }
   0x9   :  { %146 = dma.done.wait [#allocation4], 16  }
   0xa   :  { %147 = vsyncadd [#allocation4], 4294967280 }
   0xb   :  { %22 = sfence }
   0xc   :  { %s97_s19 = sld [smem:[#allocation2 + $0x5]]  ;;  %s26_s20 = sld [smem:[#allocation2]]  ;;  %v23_v0 = vld [vmem:[%s219_s1] sm:$0x1] }
   0xd   :  { %s98_s21 = sld [smem:[#allocation2 + $0x6]]  ;;  %s99_s22 = sld [smem:[#allocation2 + $0x1]] }
   0xe   :  { %s100_s23 = sld [smem:[#allocation2 + $0x7]]  ;;  %s101_s24 = sld [smem:[#allocation2 + $0x2]] }
   0xf   :  { %s179_s25 = sld [smem:[#allocation2 + $0x8]]  ;;  %s103_s26 = sld [smem:[#allocation2 + $0x3]] }
  0x10   :  { %s184_s29 = sld [smem:[#allocation2 + $0x9]]  ;;  %s105_s30 = sld [smem:[#allocation2 + $0x4]] }
  0x11   :  { %s186_s0 = sld [smem:[#allocation2 + $0xf]]  ;;  %s188_s3 = sld [smem:[#allocation2 + $0xa]] }
  0x12   :  { %v25_v1 = vstv %s97_s19  ;;  %v27_v2 = vstv %s26_s20  ;;  %s190_s4 = sld [smem:[#allocation2 + $0xb]]  ;;  %s192_s5 = sld [smem:[#allocation2 + $0xc]] }
  0x13   :  { %v28_v3 = vmul.f32 %v27_v2, %v23_v0  ;;  %v32_v4 = vstv %s98_s21  ;;  %v34_v5 = vstv %s99_s22  ;;  %s194_s6 = sld [smem:[#allocation2 + $0xd]]  ;;  %s196_s1 = sld [smem:[#allocation2 + $0xe]] }
  0x14   :  { %v35_v6 = vmul.f32 %v34_v5, %v23_v0  ;;  %v39_v7 = vstv %s100_s23  ;;  %v41_v8 = vstv %s101_s24  ;;  %s151_s7 = smov [#allocation5]  }
  0x15   :  { %v29_v9 = vadd.f32 %v28_v3, %v25_v1  ;;  %v42_v10 = vmul.f32 %v41_v8, %v23_v0  ;;  %v46_v11 = vstv %s179_s25  ;;  %v48_v12 = vstv %s103_s26  ;;  %s88_s8 = sshll.u32 %s151_s7, 4  ;;  %s89_s8 = int_to_ptr.vmem [resolvable:$true] %s88_s8 }
  0x16   :  { %v36_v13 = vadd.f32 %v35_v6, %v32_v4  ;;  %v49_v14 = vmul.f32 %v48_v12, %v23_v0  ;;  %v53_v15 = vstv %s184_s29  ;;  %v55_v16 = vstv %s105_s30  ;;  %s124_s9 = scalar_lea.vmem %s89_s8, 16  ;;  %s128_s10 = scalar_lea.vmem %s89_s8, 32 }
  0x17   :  { %v30_v17 = vmax.f32 %v29_v9, 0.0  ;;  %v43_v18 = vadd.f32 %v42_v10, %v39_v7  ;;  %v56_v19 = vmul.f32 %v55_v16, %v23_v0  ;;  %v60_v20 = vstv %s186_s0  ;;  %p125_p3 = scmp.ne.s32.totalorder %s89_s8, %s124_s9  ;;  %p129_p4 = scmp.lt.s32.totalorder %s89_s8, %s89_s8 }
  0x18   :  { %v37_v21 = vmax.f32 %v36_v13, 0.0  ;;  %v50_v22 = vadd.f32 %v49_v14, %v46_v11  ;;  %v62_v23 = vstv %s188_s3  ;;  %v66_v24 = vstv %s190_s4  ;;  %p130_p5 = scmp.lt.s32.totalorder %s128_s10, %s124_s9 }
  0x19   :  { %v44_v25 = vmax.f32 %v43_v18, 0.0  ;;  %v57_v26 = vadd.f32 %v56_v19, %v53_v15  ;;  %v63_v27 = vmul.f32 %v62_v23, %v30_v17  ;;  %v70_v28 = vstv %s192_s5 }
  0x1a   :  { %v51_v29 = vmax.f32 %v50_v22, 0.0  ;;  %v67_v30 = vmul.f32 %v66_v24, %v37_v21  ;;  %v74_v31 = vstv %s194_s6  ;;  %v78_v35 = vstv %s196_s1  ;;  %p131_p6 = por %p130_p5, %p129_p4 }
  0x1b   :  { %v58_v32 = vmax.f32 %v57_v26, 0.0  ;;  %v64_v33 = vadd.f32 %v63_v27, %v60_v20  ;;  %v71_v34 = vmul.f32 %v70_v28, %v44_v25 }
  0x1c   :  { %v75_v37 = vmul.f32 %v74_v31, %v51_v29  ;;  %p132_p7 = pnand %p131_p6, %p125_p3 }
  0x1d   :  { %v68_v36 = vadd.f32 %v67_v30, %v64_v33  ;;  %v79_v39 = vmul.f32 %v78_v35, %v58_v32 }
  0x1f   :  { %v72_v38 = vadd.f32 %v71_v34, %v68_v36 }
  0x21   :  { %v76_v40 = vadd.f32 %v75_v37, %v72_v38 }
  0x23   :  { %v80_v41 = vadd.f32 %v79_v39, %v76_v40 }
  0x25   :  { %81 = vst [vmem:[#allocation5] sm:$0x1] %v80_v41 }
  0x26   :  { %135 = shalt.err (!%p132_p7)
}
  0x27   :  { %s136_s13 = scalar_lea.hbm %s220_s2, 16 }
  0x28   :  { %p137_p8 = scmp.ne.s32.totalorder %s220_s2, %s136_s13  ;;  %p140_p9 = scmp.lt.u32.totalorder %s136_s13, %s220_s2 }
  0x2a   :  { %p142_p10 = pnand %p140_p9, %p137_p8 }
  0x2c   :  { %145 = shalt.err (!%p142_p10)
}
  0x2d   :  { %91 = dma.vmem_to_hbm [thread:$0]  %s89_s8, 16, %s220_s2, [#allocation3]  }
  0x2e   :  { %148 = dma.done.wait [#allocation3], 16  }
  0x2f   :  { %149 = vsyncadd [#allocation3], 4294967280 }
  0x30   :  { %95 = vsyncpa [#allocation3], 1 }
  0x31   :  { %96 = vsyncpa [#allocation4], 1 }

</bundles_post_ra>
